<compile_context>
chip_gen: v7x
topology: tpu7x:2x2x1
jax: 0.10.0
libtpu: 0.0.40
codegen_flags: <defaults>
</compile_context>

<pallas_src>
import jax
import jax.numpy as jnp
from jax.experimental import pallas as pl
from jax.experimental.pallas import tpu as pltpu

NEG_SLOPE = 0.01  # nn.LeakyReLU default
_MIB = 1024 * 1024


def _leaky_relu(x):
    return jnp.where(x >= 0, x, NEG_SLOPE * x)


def _round_up(x, m):
    return ((x + m - 1) // m) * m


# --------------------------------------------------------------------------
# Kernel
# --------------------------------------------------------------------------
def _mlp_kernel(x_ref, w1_ref, b1_ref, w2_ref, b2_ref, w3_ref, b3_ref, o_ref):
    x = x_ref[...]
    if x.dtype != jnp.float32:            # trace-time check; no-op for f32 input
        x = x.astype(jnp.float32)

    def layer(h, w_ref, b_ref):
        w = w_ref[...]
        if w.dtype != jnp.float32:        # bf16-resident-weight fallback path
            w = w.astype(jnp.float32)
        h = jnp.dot(h, w, preferred_element_type=jnp.float32) + b_ref[...]
        return _leaky_relu(h)

    h = layer(x, w1_ref, b1_ref)
    h = layer(h, w2_ref, b2_ref)
    h = layer(h, w3_ref, b3_ref)
    o_ref[...] = h.astype(o_ref.dtype)


# --------------------------------------------------------------------------
# Generation-aware planning helpers
# --------------------------------------------------------------------------
def _num_tensorcores():
    """TensorCores one kernel invocation can use via megacore sharding.
    v5e/v6e expose 1 TC per chip; v7x exposes 2. Conservative default: 1."""
    try:
        kind = jax.devices()[0].device_kind.lower()
    except Exception:
        return 1
    return 2 if ("7x" in kind or "v7" in kind) else 1


def _vmem_plan(num_tcs):
    """(planning budget, scoped vmem_limit_bytes), both per TensorCore."""
    try:
        cap = int(pltpu.get_tpu_info().vmem_capacity_bytes)
    except Exception:
        cap = 64 * _MIB                       # conservative: v7x per-TC VMEM
    if num_tcs >= 2:                          # v7x: 64 MiB per TensorCore
        cap = min(cap, 64 * _MIB)
    budget = min(int(cap * 0.70), 96 * _MIB)  # what the tile planner uses
    limit = min(int(cap * 0.90), 100 * _MIB)  # scoped limit given to Mosaic
    return budget, max(limit, budget)


def _choose_tile_m(M, input_size, output_size, weight_bytes, budget, split,
                   max_tile=1024):
    """Row tile: as big as VMEM allows (amortize ~0.35us/grid-step), 8-aligned,
    split into >= `split` grid steps only when multiple TensorCores share the
    row axis.  Weights are single-buffered, x/out tiles double-buffered."""
    if M <= 8:
        return M
    per_row = 4 * (input_size + output_size)            # one x row + one out row
    avail = max(budget - weight_bytes, 2 * 8 * per_row)
    max_rows = max(8, (avail // (2 * per_row)) // 8 * 8)
    tile = pl.cdiv(M, split) if split > 1 else M
    tile = min(_round_up(tile, 8), max_tile, max_rows)
    if tile >= M:
        return M                                         # single full-extent step
    return max(tile, 8)


# --------------------------------------------------------------------------
# Wrapper
# --------------------------------------------------------------------------
def feature_extractor_forward(x, params, *, tile_m=None):
    """x: (B, C, H, W). Returns (B, C, output_size)."""
    B, C = x.shape[0], x.shape[1]
    xm = x.reshape(B * C, -1)                 # (M, input_size), metadata-only
    M, input_size = xm.shape

    w1, b1, w2, b2, w3, b3 = params
    hidden_size = w1.shape[1]
    output_size = w3.shape[1]

    num_tcs = _num_tensorcores()
    budget, vmem_limit = _vmem_plan(num_tcs)

    def _nbytes(*arrs):
        return int(sum(a.size * a.dtype.itemsize for a in arrs))

    weight_bytes = _nbytes(w1, b1, w2, b2, w3, b3)

    # Fallback for very large hidden sizes (relevant on v7x's 64 MiB/TC VMEM):
    # store weights in bf16 to halve resident VMEM + weight DMA; activations
    # and accumulation remain f32.
    # TODO(synk): contraction-tiled (P3 accumulator) path for hidden sizes where
    # even bf16 resident weights exceed the per-TC VMEM budget.
    if weight_bytes > int(0.8 * budget):
        w1, w2, w3 = (w.astype(jnp.bfloat16) for w in (w1, w2, w3))
        weight_bytes = _nbytes(w1, b1, w2, b2, w3, b3)

    x_bytes = xm.size * xm.dtype.itemsize
    out_bytes = M * output_size * xm.dtype.itemsize

    # Megacore sharding of the row axis duplicates the resident-weight DMA per
    # TensorCore; only shard when activation traffic dominates weight traffic.
    shard_rows = (num_tcs >= 2) and (2 * weight_bytes <= x_bytes)
    semantics = ("parallel",) if (num_tcs == 1 or shard_rows) else ("arbitrary",)
    split = num_tcs if shard_rows else 1

    if tile_m is None:
        tile_m = _choose_tile_m(M, input_size, output_size, weight_bytes,
                                budget, split)

    grid = (pl.cdiv(M, tile_m),)

    flops = 2 * M * (input_size * hidden_size
                     + hidden_size * hidden_size
                     + hidden_size * output_size)
    cost = pl.CostEstimate(flops=flops, transcendentals=0,
                           bytes_accessed=x_bytes + out_bytes + weight_bytes)

    def _resident(shape):
        # Constant index_map -> never refetched -> single buffer is enough.
        return pl.BlockSpec(shape, lambda i: (0, 0), pipeline_mode=pl.Buffered(1))

    out = pl.pallas_call(
        _mlp_kernel,
        out_shape=jax.ShapeDtypeStruct((M, output_size), x.dtype),
        grid_spec=pltpu.PrefetchScalarGridSpec(
            num_scalar_prefetch=0,
            grid=grid,
            in_specs=[
                pl.BlockSpec((tile_m, input_size), lambda i: (i, 0)),  # x rows
                _resident((input_size, hidden_size)),                  # w1
                _resident((1, hidden_size)),                           # b1
                _resident((hidden_size, hidden_size)),                 # w2
                _resident((1, hidden_size)),                           # b2
                _resident((hidden_size, output_size)),                 # w3
                _resident((1, output_size)),                           # b3
            ],
            out_specs=pl.BlockSpec((tile_m, output_size), lambda i: (i, 0)),
        ),
        compiler_params=pltpu.CompilerParams(
            dimension_semantics=semantics,
            vmem_limit_bytes=int(vmem_limit),
        ),
        cost_estimate=cost,
    )(xm, w1, b1, w2, b2, w3, b3)

    return out.reshape(B, C, output_size)


# --------------------------------------------------------------------------
# Params / reference
# --------------------------------------------------------------------------
def init_params(key, input_size, hidden_size, output_size):
    """Deterministic init mimicking nn.Linear's uniform(-1/sqrt(fan_in), +)."""
    keys = jax.random.split(key, 6)

    def linear(kw, kb, fan_in, fan_out):
        bound = 1.0 / jnp.sqrt(float(fan_in))
        # stored already transposed: (in, out), so kernel does x @ W
        w = jax.random.uniform(kw, (fan_in, fan_out), jnp.float32, -bound, bound)
        b = jax.random.uniform(kb, (1, fan_out), jnp.float32, -bound, bound)
        return w, b

    w1, b1 = linear(keys[0], keys[1], input_size, hidden_size)
    w2, b2 = linear(keys[2], keys[3], hidden_size, hidden_size)
    w3, b3 = linear(keys[4], keys[5], hidden_size, output_size)
    return (w1, b1, w2, b2, w3, b3)


def reference_forward(x, params):
    """Pure-JAX reference of the PyTorch forward."""
    B, C = x.shape[0], x.shape[1]
    h = x.reshape(B, C, -1)
    w1, b1, w2, b2, w3, b3 = params
    h = _leaky_relu(h @ w1 + b1[0])
    h = _leaky_relu(h @ w2 + b2[0])
    h = _leaky_relu(h @ w3 + b3[0])
    return h


if __name__ == "__main__":
    B, C, H, W = 2, 4, 16, 16
    input_size = H * W        # 256
    hidden_size = 32
    output_size = 16

    key = jax.random.PRNGKey(0)
    kx, kp = jax.random.split(key)
    x = jax.random.normal(kx, (B, C, H, W), dtype=jnp.float32)
    params = init_params(kp, input_size, hidden_size, output_size)

    out = feature_extractor_forward(x, params)
    out = jax.block_until_ready(out)

    ref = reference_forward(x, params)
    assert out.shape == (B, C, output_size), out.shape
    assert jnp.allclose(out, ref, atol=1e-5, rtol=1e-5), "mismatch vs reference"

    print("KERNEL_OK")
</pallas_src>

<mosaic_0001>
module attributes {stable_mosaic.version = 11 : i64} {
  func.func @_mlp_kernel(%arg0: i32, %arg1: memref<8x256xf32, #tpu.memory_space<vmem>>, %arg2: memref<256x32xf32, #tpu.memory_space<vmem>>, %arg3: memref<1x32xf32, #tpu.memory_space<vmem>>, %arg4: memref<32x32xf32, #tpu.memory_space<vmem>>, %arg5: memref<1x32xf32, #tpu.memory_space<vmem>>, %arg6: memref<32x16xf32, #tpu.memory_space<vmem>>, %arg7: memref<1x16xf32, #tpu.memory_space<vmem>>, %arg8: memref<8x16xf32, #tpu.memory_space<vmem>>) attributes {dimension_semantics = [#tpu.dimension_semantics<parallel>], iteration_bounds = array<i64: 1>, scalar_prefetch = 0 : i64, scratch_operands = 0 : i64, tpu.core_type = #tpu.core_type<tc>, window_params = [{transform_indices = @transform_0, window_bounds = array<i64: 8, 256>}, {pipeline_mode = #tpu.pipeline_mode<synchronous>, transform_indices = @transform_1, window_bounds = array<i64: 256, 32>}, {pipeline_mode = #tpu.pipeline_mode<synchronous>, transform_indices = @transform_2, window_bounds = array<i64: 1, 32>}, {pipeline_mode = #tpu.pipeline_mode<synchronous>, transform_indices = @transform_3, window_bounds = array<i64: 32, 32>}, {pipeline_mode = #tpu.pipeline_mode<synchronous>, transform_indices = @transform_4, window_bounds = array<i64: 1, 32>}, {pipeline_mode = #tpu.pipeline_mode<synchronous>, transform_indices = @transform_5, window_bounds = array<i64: 32, 16>}, {pipeline_mode = #tpu.pipeline_mode<synchronous>, transform_indices = @transform_6, window_bounds = array<i64: 1, 16>}, {transform_indices = @transform_7, window_bounds = array<i64: 8, 16>}]} {
    %c0 = arith.constant 0 : index
    %c0_0 = arith.constant 0 : index
    %0 = vector.load %arg1[%c0, %c0_0] : memref<8x256xf32, #tpu.memory_space<vmem>>, vector<8x256xf32>
    %c0_1 = arith.constant 0 : index
    %c0_2 = arith.constant 0 : index
    %1 = vector.load %arg2[%c0_1, %c0_2] : memref<256x32xf32, #tpu.memory_space<vmem>>, vector<256x32xf32>
    %cst = arith.constant dense<0.000000e+00> : vector<8x32xf32>
    %2 = tpu.matmul %0, %1, %cst {dimension_numbers = #tpu.dot_dimension_numbers<[1], [0], [0], [1], [0, 0, 1, 1], [], []>} : vector<8x256xf32>, vector<256x32xf32>, vector<8x32xf32> -> vector<8x32xf32>
    %c0_3 = arith.constant 0 : index
    %c0_4 = arith.constant 0 : index
    %3 = vector.load %arg3[%c0_3, %c0_4] : memref<1x32xf32, #tpu.memory_space<vmem>>, vector<1x32xf32>
    %4 = vector.broadcast %3 : vector<1x32xf32> to vector<8x32xf32>
    %5 = arith.addf %2, %4 : vector<8x32xf32>
    %cst_5 = arith.constant 0.000000e+00 : f32
    %6 = vector.broadcast %cst_5 : f32 to vector<8x32xf32>
    %7 = arith.cmpf oge, %5, %6 : vector<8x32xf32>
    %cst_6 = arith.constant 0.00999999977 : f32
    %8 = vector.broadcast %cst_6 : f32 to vector<8x32xf32>
    %9 = arith.mulf %8, %5 : vector<8x32xf32>
    %10 = arith.select %7, %5, %9 : vector<8x32xi1>, vector<8x32xf32>
    %c0_7 = arith.constant 0 : index
    %c0_8 = arith.constant 0 : index
    %11 = vector.load %arg4[%c0_7, %c0_8] : memref<32x32xf32, #tpu.memory_space<vmem>>, vector<32x32xf32>
    %cst_9 = arith.constant dense<0.000000e+00> : vector<8x32xf32>
    %12 = tpu.matmul %10, %11, %cst_9 {dimension_numbers = #tpu.dot_dimension_numbers<[1], [0], [0], [1], [0, 0, 1, 1], [], []>} : vector<8x32xf32>, vector<32x32xf32>, vector<8x32xf32> -> vector<8x32xf32>
    %c0_10 = arith.constant 0 : index
    %c0_11 = arith.constant 0 : index
    %13 = vector.load %arg5[%c0_10, %c0_11] : memref<1x32xf32, #tpu.memory_space<vmem>>, vector<1x32xf32>
    %14 = vector.broadcast %13 : vector<1x32xf32> to vector<8x32xf32>
    %15 = arith.addf %12, %14 : vector<8x32xf32>
    %cst_12 = arith.constant 0.000000e+00 : f32
    %16 = vector.broadcast %cst_12 : f32 to vector<8x32xf32>
    %17 = arith.cmpf oge, %15, %16 : vector<8x32xf32>
    %cst_13 = arith.constant 0.00999999977 : f32
    %18 = vector.broadcast %cst_13 : f32 to vector<8x32xf32>
    %19 = arith.mulf %18, %15 : vector<8x32xf32>
    %20 = arith.select %17, %15, %19 : vector<8x32xi1>, vector<8x32xf32>
    %c0_14 = arith.constant 0 : index
    %c0_15 = arith.constant 0 : index
    %21 = vector.load %arg6[%c0_14, %c0_15] : memref<32x16xf32, #tpu.memory_space<vmem>>, vector<32x16xf32>
    %cst_16 = arith.constant dense<0.000000e+00> : vector<8x16xf32>
    %22 = tpu.matmul %20, %21, %cst_16 {dimension_numbers = #tpu.dot_dimension_numbers<[1], [0], [0], [1], [0, 0, 1, 1], [], []>} : vector<8x32xf32>, vector<32x16xf32>, vector<8x16xf32> -> vector<8x16xf32>
    %c0_17 = arith.constant 0 : index
    %c0_18 = arith.constant 0 : index
    %23 = vector.load %arg7[%c0_17, %c0_18] : memref<1x16xf32, #tpu.memory_space<vmem>>, vector<1x16xf32>
    %24 = vector.broadcast %23 : vector<1x16xf32> to vector<8x16xf32>
    %25 = arith.addf %22, %24 : vector<8x16xf32>
    %cst_19 = arith.constant 0.000000e+00 : f32
    %26 = vector.broadcast %cst_19 : f32 to vector<8x16xf32>
    %27 = arith.cmpf oge, %25, %26 : vector<8x16xf32>
    %cst_20 = arith.constant 0.00999999977 : f32
    %28 = vector.broadcast %cst_20 : f32 to vector<8x16xf32>
    %29 = arith.mulf %28, %25 : vector<8x16xf32>
    %30 = arith.select %27, %25, %29 : vector<8x16xi1>, vector<8x16xf32>
    %c0_21 = arith.constant 0 : index
    %c0_22 = arith.constant 0 : index
    %31 = vector.load %arg8[%c0_21, %c0_22] : memref<8x16xf32, #tpu.memory_space<vmem>>, vector<8x16xf32>
    tpu.vector_store %arg8[%c0_21, %c0_22], %30 {strides = array<i32>} : memref<8x16xf32, #tpu.memory_space<vmem>>, vector<8x16xf32>,
    return
  }
  func.func @transform_0(%arg0: i32) -> (i32, i32) {
    %c0_i32 = arith.constant 0 : i32
    %c0_i32_0 = arith.constant 0 : i32
    return %arg0, %c0_i32 : i32, i32
  }
  func.func @transform_1(%arg0: i32) -> (i32, i32) {
    %c0_i32 = arith.constant 0 : i32
    %c0_i32_0 = arith.constant 0 : i32
    %c0_i32_1 = arith.constant 0 : i32
    return %c0_i32, %c0_i32_0 : i32, i32
  }
  func.func @transform_2(%arg0: i32) -> (i32, i32) {
    %c0_i32 = arith.constant 0 : i32
    %c0_i32_0 = arith.constant 0 : i32
    %c0_i32_1 = arith.constant 0 : i32
    return %c0_i32, %c0_i32_0 : i32, i32
  }
  func.func @transform_3(%arg0: i32) -> (i32, i32) {
    %c0_i32 = arith.constant 0 : i32
    %c0_i32_0 = arith.constant 0 : i32
    %c0_i32_1 = arith.constant 0 : i32
    return %c0_i32, %c0_i32_0 : i32, i32
  }
  func.func @transform_4(%arg0: i32) -> (i32, i32) {
    %c0_i32 = arith.constant 0 : i32
    %c0_i32_0 = arith.constant 0 : i32
    %c0_i32_1 = arith.constant 0 : i32
    return %c0_i32, %c0_i32_0 : i32, i32
  }
  func.func @transform_5(%arg0: i32) -> (i32, i32) {
    %c0_i32 = arith.constant 0 : i32
    %c0_i32_0 = arith.constant 0 : i32
    %c0_i32_1 = arith.constant 0 : i32
    return %c0_i32, %c0_i32_0 : i32, i32
  }
  func.func @transform_6(%arg0: i32) -> (i32, i32) {
    %c0_i32 = arith.constant 0 : i32
    %c0_i32_0 = arith.constant 0 : i32
    %c0_i32_1 = arith.constant 0 : i32
    return %c0_i32, %c0_i32_0 : i32, i32
  }
  func.func @transform_7(%arg0: i32) -> (i32, i32) {
    %c0_i32 = arith.constant 0 : i32
    %c0_i32_0 = arith.constant 0 : i32
    return %arg0, %c0_i32 : i32, i32
  }
}

</mosaic_0001>

<bundles_post_ra>
// kernel: tpu_custom_call.1
= control target key start
LH: loop header
LB: loop body
LE: loop exit
PB: predicated region body
PF: predicated region fallthrough
CT: control target
= control target key end

     0   :  { %s671_s0 = inlined_call_operand.vmem [shape: f32[8,256], index: 0, kind: input, shape index: {}]   ;;  %s672_s1 = inlined_call_operand.vmem [shape: f32[256,32], index: 1, kind: input, shape index: {}]   ;;  %s673_s2 = inlined_call_operand.vmem [shape: f32[1,32], index: 2, kind: input, shape index: {}]   ;;  %s674_s3 = inlined_call_operand.vmem [shape: f32[32,32], index: 3, kind: input, shape index: {}]   ;;  %s675_s4 = inlined_call_operand.vmem [shape: f32[1,32], index: 4, kind: input, shape index: {}]   ;;  %s676_s5 = inlined_call_operand.vmem [shape: f32[32,16], index: 5, kind: input, shape index: {}]   ;;  %s677_s6 = inlined_call_operand.vmem [shape: f32[1,16], index: 6, kind: input, shape index: {}]   ;;  %s678_s7 = inlined_call_operand.hbm [shape: f32[8,16], index: 7, kind: output, shape index: {}]  }
   0x1   :  { %v45_v0 = vld [vmem:[%s672_s1 + $0x80] sm:$0xff]  ;;  %v46_v1 = vld [vmem:[%s672_s1 + $0x88] sm:$0xff]  ;;  %v47_v5 = vld [vmem:[%s672_s1 + $0x90] sm:$0xff] }
   0x2   :  { %v29_v2 = vld [vmem:[%s672_s1] sm:$0xff]  ;;  %v404_v3 = vpack.c.bf16 %v46_v1, %v45_v0  ;;  %v30_v4 = vld [vmem:[%s672_s1 + $0x8] sm:$0xff]  ;;  %v48_v6 = vld [vmem:[%s672_s1 + $0x98] sm:$0xff] }
   0x3   :  { %v406_v7 = vpack.c.bf16 %v30_v4, %v29_v2  ;;  %v408_v8 = vpack.c.bf16 %v48_v6, %v47_v5  ;;  %v31_v9 = vld [vmem:[%s672_s1 + $0x10] sm:$0xff]  ;;  %v32_v10 = vld [vmem:[%s672_s1 + $0x18] sm:$0xff]  ;;  %v49_v11 = vld [vmem:[%s672_s1 + $0xa0] sm:$0xff] }
   0x4   :  { %405 = vmatprep.subr.bf16.mxu0 %v404_v3  ;;  %v50_v12 = vld [vmem:[%s672_s1 + $0xa8] sm:$0xff]  ;;  %v410_v13 = vpack.c.bf16 %v32_v10, %v31_v9  ;;  %v33_v15 = vld [vmem:[%s672_s1 + $0x20] sm:$0xff]  ;;  %v51_v17 = vld [vmem:[%s672_s1 + $0xb0] sm:$0xff] }
   0x5   :  { %407 = vmatpush3.bf16.msra.mxu0 %v406_v7  ;;  %v412_v14 = vpack.c.bf16 %v50_v12, %v49_v11  ;;  %v34_v16 = vld [vmem:[%s672_s1 + $0x28] sm:$0xff]  ;;  %v52_v18 = vld [vmem:[%s672_s1 + $0xb8] sm:$0xff]  ;;  %v35_v21 = vld [vmem:[%s672_s1 + $0x30] sm:$0xff] }
   0x6   :  { %409 = vmatprep.subr.bf16.mxu0 %v408_v8  ;;  %v414_v19 = vpack.c.bf16 %v34_v16, %v33_v15  ;;  %v416_v20 = vpack.c.bf16 %v52_v18, %v51_v17  ;;  %v36_v22 = vld [vmem:[%s672_s1 + $0x38] sm:$0xff]  ;;  %v53_v23 = vld [vmem:[%s672_s1 + $0xc0] sm:$0xff]  ;;  %v54_v24 = vld [vmem:[%s672_s1 + $0xc8] sm:$0xff] }
   0x7   :  { %v28_v25 = vld [vmem:[%s671_s0 + $0x8] sm:$0xff] }
   0x8   :  { %132 = vmatprep.mubr.f32.mxu0 %v28_v25 }
   0x9   :  { %411 = vmatpush3.bf16.msra.mxu0 %v410_v13 }
   0xa   :  { %413 = vmatprep.subr.bf16.mxu0 %v412_v14 }
   0xb   :  { %12 = vsyncpa [#allocation3], 0  ;;  %v418_v26 = vpack.c.bf16 %v36_v22, %v35_v21  ;;  %v420_v27 = vpack.c.bf16 %v54_v24, %v53_v23  ;;  %v37_v28 = vld [vmem:[%s672_s1 + $0x40] sm:$0xff]  ;;  %v38_v29 = vld [vmem:[%s672_s1 + $0x48] sm:$0xff]  ;;  %v476_v53 = vmov 0.0|0.0   ;;  %vm477_vm0 = vmmov 0  }
   0xc   :  { %v55_v30 = vld [vmem:[%s672_s1 + $0xd0] sm:$0xff]  ;;  %v56_v31 = vld [vmem:[%s672_s1 + $0xd8] sm:$0xff]  ;;  %v422_v32 = vpack.c.bf16 %v38_v29, %v37_v28  ;;  %v57_v36 = vld [vmem:[%s672_s1 + $0xe0] sm:$0xff]  ;;  %436 = vmatprep.subr.bf16.mxu1 %v476_v53  ;;  %v478_v57 = vmov 0.0   ;;  %vm152_vm2 = vcmask 261120   ;;  %vm316_vm5 = vcmask 130048  }
   0xd   :  { %415 = vmatpush3.bf16.msra.mxu0 %v414_v19  ;;  %v424_v33 = vpack.c.bf16 %v56_v31, %v55_v30  ;;  %v39_v34 = vld [vmem:[%s672_s1 + $0x50] sm:$0xff]  ;;  %v40_v35 = vld [vmem:[%s672_s1 + $0x58] sm:$0xff]  ;;  %v58_v37 = vld [vmem:[%s672_s1 + $0xe8] sm:$0xff]  ;;  %390 = vmatprep.mubr.msk.f32.mxu1 %vm477_vm0, %v478_v57 }
   0xe   :  { %417 = vmatprep.subr.bf16.mxu0 %v416_v20  ;;  %v426_v38 = vpack.c.bf16 %v40_v35, %v39_v34  ;;  %v428_v39 = vpack.c.bf16 %v58_v37, %v57_v36  ;;  %v41_v40 = vld [vmem:[%s672_s1 + $0x60] sm:$0xff]  ;;  %v42_v41 = vld [vmem:[%s672_s1 + $0x68] sm:$0xff]  ;;  %v59_v42 = vld [vmem:[%s672_s1 + $0xf0] sm:$0xff] }
   0xf   :  { %v60_v43 = vld [vmem:[%s672_s1 + $0xf8] sm:$0xff]  ;;  %v430_v44 = vpack.c.bf16 %v42_v41, %v41_v40  ;;  %v43_v46 = vld [vmem:[%s672_s1 + $0x70] sm:$0xff]  ;;  %v27_v49 = vld [vmem:[%s671_s0] sm:$0xff] }
  0x10   :  { %v432_v45 = vpack.c.bf16 %v60_v43, %v59_v42  ;;  %v44_v47 = vld [vmem:[%s672_s1 + $0x78] sm:$0xff]  ;;  %v141_v50 = vld [vmem:[%s674_s3] sm:$0xff]  ;;  %v142_v51 = vld [vmem:[%s674_s3 + $0x8] sm:$0xff] }
  0x11   :  { %419 = vmatpush3.bf16.msra.mxu0 %v418_v26  ;;  %v434_v48 = vpack.c.bf16 %v44_v47, %v43_v46  ;;  %v437_v52 = vpack.c.bf16 %v142_v51, %v141_v50  ;;  %v143_v54 = vld [vmem:[%s674_s3 + $0x10] sm:$0xff]  ;;  %v144_v55 = vld [vmem:[%s674_s3 + $0x18] sm:$0xff]  ;;  %v332_v59 = vld [vmem:[%s673_s2] ss:$0 sm:$0xff] }
  0x12   :  { %421 = vmatprep.subr.bf16.mxu0 %v420_v27  ;;  %v440_v56 = vpack.c.bf16 %v144_v55, %v143_v54  ;;  %v229_v62 = vld [vmem:[%s676_s5] sm:$0xff]  ;;  %v230_v63 = vld [vmem:[%s676_s5 + $0x8] sm:$0xff]  ;;  %v231_v4 = vld [vmem:[%s676_s5 + $0x10] sm:$0xff] }
  0x13   :  { %438 = vmatpush3.bf16.msra.mxu1 %v437_v52  ;;  %v443_v2 = vpack.c.bf16 %v230_v63, %v229_v62  ;;  %v232_v5 = vld [vmem:[%s676_s5 + $0x18] sm:$0xff]  ;;  %v333_v7 = vld [vmem:[%s675_s4] ss:$0 sm:$0xff]  ;;  %s479_s5 = smov [#allocation2]  }
  0x14   :  { %439 = vmatprep.subr.bf16.mxu1 %v476_v53  ;;  %v446_v6 = vpack.c.bf16 %v232_v5, %v231_v4  ;;  %v335_v13 = vld [vmem:[%s677_s6] ss:$0 sm:$0xff]  ;;  %s324_s18 = sshll.u32 %s479_s5, 4  ;;  %s325_s18 = int_to_ptr.vmem [resolvable:$true] %s324_s18 }
  0x15   :  { %423 = vmatpush3.bf16.msra.mxu0 %v422_v32  ;;  %s452_s4 = scalar_lea.vmem %s325_s18, 128  ;;  %p457_p1 = scmp.lt.s32.totalorder %s325_s18, %s325_s18 }
  0x16   :  { %425 = vmatprep.subr.bf16.mxu0 %v424_v33  ;;  %p453_p0 = scmp.ne.s32.totalorder %s325_s18, %s452_s4  ;;  %p458_p2 = scmp.lt.s32.totalorder %s452_s4, %s452_s4 }
  0x17   :  { %441 = vmatpush3.bf16.msra.mxu1 %v440_v56 }
  0x18   :  { %442 = vmatprep.subr.bf16.mxu1 %v476_v53  ;;  %p459_p3 = por %p458_p2, %p457_p1 }
  0x19   :  { %427 = vmatpush3.bf16.msra.mxu0 %v426_v38 }
  0x1a   :  { %429 = vmatprep.subr.bf16.mxu0 %v428_v39  ;;  %p460_p4 = pnand %p459_p3, %p453_p0 }
  0x1d   :  { %431 = vmatpush3.bf16.msra.mxu0 %v430_v44 }
  0x1e   :  { %433 = vmatprep.subr.bf16.mxu0 %v432_v45 }
  0x21   :  { %435 = vmatpush3.bf16.msra.mxu0 %v434_v48 }
  0x24   :  { %133 = vmatmul.mubr.f32.vlgmr.msra.gmra.mrb[0].mxu0 %v27_v49 }
  0xf7   :  { %v369_v58 = vpop.f32.mrb[0].mxu0 }
  0xf8   :  { %v370_v60 = vpop.f32.mrb[1].mxu0 }
  0xf9   :  { %v371_v61 = vadd.f32 %v370_v60, %v369_v58 }
  0xfb   :  { %v135_v0 = vadd.f32 %v371_v61, %v332_v59 }
  0xfd   :  { %v139_v1 = vmul.f32 0.01, %v135_v0  ;;  %vm138_vm1 = vcmp.ge.f32.partialorder %v135_v0, 0.0 }
  0xff   :  { %v140_v3 = vsel %vm138_vm1, %v135_v0, %v139_v1 }
 0x100   :  { %391 = vmatmul.mubr.msk.f32.vlgmr.msra.gmra.mrb[0].mxu1 %vm152_vm2, %v140_v3 }
 0x101   :  { %444 = vmatpush3.bf16.msra.mxu1 %v443_v2  ;;  %401 = vmatprep.mubr.msk.f32.mxu1 %vm477_vm0, %v478_v57 }
 0x102   :  { %445 = vmatprep.subr.bf16.mxu1 %v476_v53 }
 0x105   :  { %447 = vmatpush3.bf16.msra.mxu1 %v446_v6 }
 0x1d3   :  { %v222_v8 = vpop.f32.mrb[0].mxu1 }
 0x1d4   :  { %v223_v9 = vadd.f32 %v333_v7, %v222_v8  ;;  %v392_v10 = vpop.f32.mrb[1].mxu1 }
 0x1d6   :  { %vm226_vm3 = vcmp.ge.f32.partialorder %v223_v9, 0.0  ;;  %v227_v11 = vmul.f32 0.01, %v223_v9 }
 0x1d8   :  { %v228_v12 = vsel %vm226_vm3, %v223_v9, %v227_v11 }
 0x1d9   :  { %402 = vmatmul.mubr.msk.f32.vlgmr.msra.gmra.mrb[2].mxu1 %vm152_vm2, %v228_v12 }
 0x2ac   :  { %v309_v14 = vpop.f32.mrb[2].mxu1 }
 0x2ad   :  { %v310_v15 = vadd.f32 %v335_v13, %v309_v14  ;;  %v403_v16 = vpop.f32.mrb[3].mxu1 }
 0x2af   :  { %v314_v17 = vmul.f32 0.01, %v310_v15  ;;  %vm313_vm4 = vcmp.ge.f32.partialorder %v310_v15, 0.0 }
 0x2b1   :  { %v315_v18 = vsel %vm313_vm4, %v310_v15, %v314_v17 }
 0x2b2   :  { %317 = vst.msk [vmem:[#allocation2] sm:$0xff] %vm316_vm5, %v315_v18 }
 0x2b3   :  { %463 = shalt.err (!%p460_p4)
}
 0x2b4   :  { %s464_s20 = scalar_lea.hbm %s678_s7, 128 }
 0x2b5   :  { %p465_p5 = scmp.ne.s32.totalorder %s678_s7, %s464_s20  ;;  %p468_p6 = scmp.lt.u32.totalorder %s464_s20, %s678_s7 }
 0x2b7   :  { %p470_p7 = pnand %p468_p6, %p465_p5 }
 0x2b9   :  { %473 = shalt.err (!%p470_p7)
}
 0x2ba   :  { %327 = dma.vmem_to_hbm [thread:$0]  %s325_s18, 128, %s678_s7, [#allocation3]  }
 0x2bb   :  { %474 = dma.done.wait [#allocation3], 128  }
 0x2bc   :  { %475 = vsyncadd [#allocation3], 4294967168 }
 0x2bd   :  { %331 = vsyncpa [#allocation3], 1 }

</bundles_post_ra>
